<compile_context>
chip_gen: v6e
topology: v6e:2x2x1
jax: 0.10.0
libtpu: 0.0.40
codegen_flags: <defaults>
</compile_context>

<pallas_src>
import functools

import jax
import jax.numpy as jnp
from jax.experimental import pallas as pl
from jax.experimental.pallas import tpu as pltpu


def _round_down(x, m):
    return (x // m) * m


@functools.lru_cache(maxsize=None)
def _vmem_limit_bytes():
    # Conservative fallback = v7x (64 MiB physical per TensorCore).
    phys = 64 * 1024 * 1024
    try:
        phys = int(pltpu.get_tpu_info().vmem_capacity_bytes)
    except Exception:
        pass
    # Leave ~1/4 of physical VMEM as headroom; never ask for more than 64 MiB
    # (v5e/v6e have 128 MiB physical, v7x only 64 MiB -> ~48 MiB there).
    return int(min(64 * 1024 * 1024, (phys * 3) // 4))


@functools.lru_cache(maxsize=None)
def _tile_budget_bytes():
    # Per-tile-buffer budget: 2x double-buffered input + 2x output tiles plus
    # ~3 f32 intermediates inside the kernel ~= 8 tile-equivalents, plus a few
    # MiB of headroom for Mosaic internal scratch.
    limit = _vmem_limit_bytes()
    return int(max(1 << 20, min(6 << 20, (limit - (4 << 20)) // 8)))


def _pick_row_tile(rows, row_bytes, *, align=8, min_steps=4):
    """Largest sublane-aligned row tile within the VMEM budget that still
    leaves >= min_steps grid steps (pipelining + v7x megacore sharding)."""
    if rows <= align:
        return rows                                     # full-extent block
    budget = _tile_budget_bytes()
    tile = max(align, _round_down(budget // max(row_bytes, 1), align))
    tile = min(tile, max(align, _round_down(rows // min_steps, align)))
    return tile


# ----------------------------------------------------------------------------
# Kernels
# ----------------------------------------------------------------------------

def _softmax_kernel(x_ref, o_ref, *, axis):
    """Whole-tile numerically-stable softmax along `axis`."""
    x = x_ref[...].astype(jnp.float32)
    m = jnp.max(x, axis=axis, keepdims=True)
    e = jnp.exp(x - m)
    s = jnp.sum(e, axis=axis, keepdims=True)
    # One divide per row instead of n divides (EUP pressure matters on v7x).
    o_ref[...] = (e * (1.0 / s)).astype(o_ref.dtype)


def _folded_softmax_kernel(x_ref, o_ref, *, seg):
    """Softmax over aligned groups of `seg` lanes of a lane-dense tile.

    The tile packs (width // seg) independent rows into each 128-lane block,
    so the HBM DMAs and the vreg->VMEM stores are lane-dense.  The per-segment
    max/sum are computed with a log2(seg)-step butterfly (XLU rolls), which
    leaves every lane holding its segment's reduction (already broadcast).
    """
    x = x_ref[...].astype(jnp.float32)                  # (rows, width)
    width = x.shape[-1]
    lane = jax.lax.broadcasted_iota(jnp.int32, (1, width), 1)

    # Partner-selection masks for each butterfly step.  They are computed with
    # the same roll op as the data, so the pairing is correct regardless of
    # the roll direction convention.
    steps = []
    k = 1
    while k < seg:
        src_a = pltpu.roll(lane, width - k, axis=1)     # source lane of roll A
        use_a = src_a == (lane ^ k)                     # is A the XOR-k partner?
        steps.append((k, use_a))
        k *= 2

    def seg_allreduce(v, combine):
        for kk, use_a in steps:
            a = pltpu.roll(v, width - kk, axis=1)
            b = pltpu.roll(v, kk, axis=1)
            v = combine(v, jnp.where(use_a, a, b))
        return v

    m = seg_allreduce(x, jnp.maximum)                   # segment max, all lanes
    e = jnp.exp(x - m)
    s = seg_allreduce(e, jnp.add)                       # segment sum, all lanes
    o_ref[...] = (e * (1.0 / s)).astype(o_ref.dtype)


# ----------------------------------------------------------------------------
# pallas_call wrappers
# ----------------------------------------------------------------------------

def _rowwise_call(x2d, kernel_fn):
    """Tile a 2-D array along rows and run `kernel_fn` per (tile_rows, width)
    block.  Ragged row counts become a partial final block (no pad/slice)."""
    rows, width = x2d.shape
    tile_rows = _pick_row_tile(rows, width * 4)         # f32 intermediates
    grid = (pl.cdiv(rows, tile_rows),)
    return pl.pallas_call(
        kernel_fn,
        out_shape=jax.ShapeDtypeStruct((rows, width), x2d.dtype),
        grid_spec=pltpu.PrefetchScalarGridSpec(
            num_scalar_prefetch=0,
            grid=grid,
            in_specs=[pl.BlockSpec((tile_rows, width), lambda i: (i, 0))],
            out_specs=pl.BlockSpec((tile_rows, width), lambda i: (i, 0)),
        ),
        compiler_params=pltpu.CompilerParams(
            dimension_semantics=("parallel",),
            vmem_limit_bytes=_vmem_limit_bytes(),
        ),
    )(x2d)


def _softmax_lastdim(x2d):
    """Softmax along the last axis of a 2-D array (lane-axis reduction)."""
    # TODO(synk): reduction dims so large that an 8-row f32 tile (+ double
    # buffering) exceeds the VMEM limit need a blocked online-softmax variant
    # (running max/sum scratch over an 'arbitrary' n-chunk grid axis).
    return _rowwise_call(x2d, functools.partial(_softmax_kernel, axis=-1))


def _softmax_lastdim_folded(x_folded, seg):
    """Lane-dense softmax: each 128-lane row holds 128//seg independent rows."""
    return _rowwise_call(
        x_folded, functools.partial(_folded_softmax_kernel, seg=seg))


def _softmax_middle(x3d):
    """Softmax along axis 1 of (outer, n, inner) (sublane-axis reduction)."""
    outer, n, inner = x3d.shape
    budget = _tile_budget_bytes()
    col_bytes = n * 4                                    # one (n,) column, f32

    if inner <= 128 or inner * col_bytes <= budget:
        tile_inner = inner                               # full-extent lane block
    else:
        tile_inner = max(128, _round_down(budget // col_bytes, 128))
    grid_inner = pl.cdiv(inner, tile_inner)

    # Batch several `outer` rows per block so small-n (e.g. NCHW channel)
    # shapes still get multi-MiB tiles; keep >= 4 total grid steps when the
    # problem is big enough (per-core pipelining on v7x megacore).
    tile_outer = max(1, budget // (tile_inner * col_bytes))
    if outer >= 4 and grid_inner < 4:
        tile_outer = min(tile_outer, max(1, outer // 4))
    tile_outer = min(tile_outer, outer)

    grid = (pl.cdiv(outer, tile_outer), grid_inner)
    # TODO(synk): inner < 128 still emits masked (lane-sparse) stores here; a
    # lane-folding variant like the last-dim path would make them dense.
    return pl.pallas_call(
        functools.partial(_softmax_kernel, axis=1),
        out_shape=jax.ShapeDtypeStruct((outer, n, inner), x3d.dtype),
        grid_spec=pltpu.PrefetchScalarGridSpec(
            num_scalar_prefetch=0,
            grid=grid,
            in_specs=[pl.BlockSpec((tile_outer, n, tile_inner),
                                   lambda o, i: (o, 0, i))],
            out_specs=pl.BlockSpec((tile_outer, n, tile_inner),
                                   lambda o, i: (o, 0, i)),
        ),
        compiler_params=pltpu.CompilerParams(
            dimension_semantics=("parallel", "parallel"),
            vmem_limit_bytes=_vmem_limit_bytes(),
        ),
    )(x3d)


def pallas_softmax(x, dim):
    """Softmax over `dim`, matching the PyTorch reference module's forward."""
    ndim = x.ndim
    dim = dim % ndim
    shape = x.shape
    n = shape[dim]

    outer = 1
    for s in shape[:dim]:
        outer *= s
    inner = 1
    for s in shape[dim + 1:]:
        inner *= s

    if inner == 1:
        # Reduction over the minor (lane) axis.
        if 0 < n <= 32 and 128 % n == 0 and outer % (128 // n) == 0:
            # Lane-dense path: fold g = 128 // n rows into each 128-lane block.
            g = 128 // n
            out = _softmax_lastdim_folded(x.reshape(outer // g, g * n), seg=n)
            return out.reshape(shape)
        out = _softmax_lastdim(x.reshape(outer, n))
    else:
        # Reduce along sublanes; no wrapper-side transpose (free reshape only).
        out = _softmax_middle(x.reshape(outer, n, inner))
    return out.reshape(shape)


if __name__ == "__main__":
    key = jax.random.PRNGKey(0)
    # Small NCHW-like input consistent with the module's forward(x, dim).
    x = jax.random.normal(key, (2, 4, 16, 16), dtype=jnp.float32)

    def ref_softmax(v, d):
        m = jnp.max(v, axis=d, keepdims=True)
        e = jnp.exp(v - m)
        return e / jnp.sum(e, axis=d, keepdims=True)

    # Last-axis softmax (n=16 -> lane-dense folded path).
    out_last = pallas_softmax(x, -1)
    jax.block_until_ready(out_last)
    assert out_last.shape == x.shape and out_last.dtype == x.dtype
    assert jnp.allclose(out_last, ref_softmax(x, -1), atol=1e-6, rtol=1e-6)

    # Non-last-axis softmax (sublane reduction, batched `outer` blocks).
    out_mid = pallas_softmax(x, 1)
    jax.block_until_ready(out_mid)
    assert out_mid.shape == x.shape and out_mid.dtype == x.dtype
    assert jnp.allclose(out_mid, ref_softmax(x, 1), atol=1e-6, rtol=1e-6)

    # Ragged row count + non-folding width exercises the partial final block
    # (no-pad / no-slice) plain last-dim path.
    x2 = jax.random.normal(jax.random.PRNGKey(0), (3, 7, 96), dtype=jnp.float32)
    out2 = pallas_softmax(x2, -1)
    jax.block_until_ready(out2)
    assert out2.shape == x2.shape and out2.dtype == x2.dtype
    assert jnp.allclose(out2, ref_softmax(x2, -1), atol=1e-6, rtol=1e-6)

    print("KERNEL_OK")
</pallas_src>

<mosaic_0001>
module attributes {stable_mosaic.version = 11 : i64} {
  func.func @_folded_softmax_kernel(%arg0: i32, %arg1: memref<8x128xf32, #tpu.memory_space<vmem>>, %arg2: memref<8x128xf32, #tpu.memory_space<vmem>>) attributes {dimension_semantics = [#tpu.dimension_semantics<parallel>], iteration_bounds = array<i64: 2>, scalar_prefetch = 0 : i64, scratch_operands = 0 : i64, tpu.core_type = #tpu.core_type<tc>, window_params = [{transform_indices = @transform_0, window_bounds = array<i64: 8, 128>}, {transform_indices = @transform_1, window_bounds = array<i64: 8, 128>}]} {
    %c0 = arith.constant 0 : index
    %c0_0 = arith.constant 0 : index
    %0 = vector.load %arg1[%c0, %c0_0] : memref<8x128xf32, #tpu.memory_space<vmem>>, vector<8x128xf32>
    %1 = tpu.iota {dimensions = array<i32: 1>} : vector<1x128xi32>
    %c127_i32 = arith.constant 127 : i32
    %2 = tpu.dynamic_rotate %1 by %c127_i32 dim 1 : vector<1x128xi32>, i32 -> vector<1x128xi32>
    %c1_i32 = arith.constant 1 : i32
    %3 = vector.broadcast %c1_i32 : i32 to vector<1x128xi32>
    %4 = arith.xori %1, %3 : vector<1x128xi32>
    %5 = arith.cmpi eq, %2, %4 : vector<1x128xi32>
    %c126_i32 = arith.constant 126 : i32
    %6 = tpu.dynamic_rotate %1 by %c126_i32 dim 1 : vector<1x128xi32>, i32 -> vector<1x128xi32>
    %c2_i32 = arith.constant 2 : i32
    %7 = vector.broadcast %c2_i32 : i32 to vector<1x128xi32>
    %8 = arith.xori %1, %7 : vector<1x128xi32>
    %9 = arith.cmpi eq, %6, %8 : vector<1x128xi32>
    %c124_i32 = arith.constant 124 : i32
    %10 = tpu.dynamic_rotate %1 by %c124_i32 dim 1 : vector<1x128xi32>, i32 -> vector<1x128xi32>
    %c4_i32 = arith.constant 4 : i32
    %11 = vector.broadcast %c4_i32 : i32 to vector<1x128xi32>
    %12 = arith.xori %1, %11 : vector<1x128xi32>
    %13 = arith.cmpi eq, %10, %12 : vector<1x128xi32>
    %c120_i32 = arith.constant 120 : i32
    %14 = tpu.dynamic_rotate %1 by %c120_i32 dim 1 : vector<1x128xi32>, i32 -> vector<1x128xi32>
    %c8_i32 = arith.constant 8 : i32
    %15 = vector.broadcast %c8_i32 : i32 to vector<1x128xi32>
    %16 = arith.xori %1, %15 : vector<1x128xi32>
    %17 = arith.cmpi eq, %14, %16 : vector<1x128xi32>
    %c127_i32_1 = arith.constant 127 : i32
    %18 = tpu.dynamic_rotate %0 by %c127_i32_1 dim 1 : vector<8x128xf32>, i32 -> vector<8x128xf32>
    %c1_i32_2 = arith.constant 1 : i32
    %19 = tpu.dynamic_rotate %0 by %c1_i32_2 dim 1 : vector<8x128xf32>, i32 -> vector<8x128xf32>
    %20 = vector.shape_cast %5 : vector<1x128xi1> to vector<1x128xi1>
    %21 = vector.broadcast %20 : vector<1x128xi1> to vector<8x128xi1>
    %22 = arith.select %21, %18, %19 : vector<8x128xi1>, vector<8x128xf32>
    %23 = arith.maximumf %0, %22 : vector<8x128xf32>
    %c126_i32_3 = arith.constant 126 : i32
    %24 = tpu.dynamic_rotate %23 by %c126_i32_3 dim 1 : vector<8x128xf32>, i32 -> vector<8x128xf32>
    %c2_i32_4 = arith.constant 2 : i32
    %25 = tpu.dynamic_rotate %23 by %c2_i32_4 dim 1 : vector<8x128xf32>, i32 -> vector<8x128xf32>
    %26 = vector.shape_cast %9 : vector<1x128xi1> to vector<1x128xi1>
    %27 = vector.broadcast %26 : vector<1x128xi1> to vector<8x128xi1>
    %28 = arith.select %27, %24, %25 : vector<8x128xi1>, vector<8x128xf32>
    %29 = arith.maximumf %23, %28 : vector<8x128xf32>
    %c124_i32_5 = arith.constant 124 : i32
    %30 = tpu.dynamic_rotate %29 by %c124_i32_5 dim 1 : vector<8x128xf32>, i32 -> vector<8x128xf32>
    %c4_i32_6 = arith.constant 4 : i32
    %31 = tpu.dynamic_rotate %29 by %c4_i32_6 dim 1 : vector<8x128xf32>, i32 -> vector<8x128xf32>
    %32 = vector.shape_cast %13 : vector<1x128xi1> to vector<1x128xi1>
    %33 = vector.broadcast %32 : vector<1x128xi1> to vector<8x128xi1>
    %34 = arith.select %33, %30, %31 : vector<8x128xi1>, vector<8x128xf32>
    %35 = arith.maximumf %29, %34 : vector<8x128xf32>
    %c120_i32_7 = arith.constant 120 : i32
    %36 = tpu.dynamic_rotate %35 by %c120_i32_7 dim 1 : vector<8x128xf32>, i32 -> vector<8x128xf32>
    %c8_i32_8 = arith.constant 8 : i32
    %37 = tpu.dynamic_rotate %35 by %c8_i32_8 dim 1 : vector<8x128xf32>, i32 -> vector<8x128xf32>
    %38 = vector.shape_cast %17 : vector<1x128xi1> to vector<1x128xi1>
    %39 = vector.broadcast %38 : vector<1x128xi1> to vector<8x128xi1>
    %40 = arith.select %39, %36, %37 : vector<8x128xi1>, vector<8x128xf32>
    %41 = arith.maximumf %35, %40 : vector<8x128xf32>
    %42 = arith.subf %0, %41 : vector<8x128xf32>
    %43 = math.exp %42 : vector<8x128xf32>
    %c127_i32_9 = arith.constant 127 : i32
    %44 = tpu.dynamic_rotate %43 by %c127_i32_9 dim 1 : vector<8x128xf32>, i32 -> vector<8x128xf32>
    %c1_i32_10 = arith.constant 1 : i32
    %45 = tpu.dynamic_rotate %43 by %c1_i32_10 dim 1 : vector<8x128xf32>, i32 -> vector<8x128xf32>
    %46 = vector.shape_cast %5 : vector<1x128xi1> to vector<1x128xi1>
    %47 = vector.broadcast %46 : vector<1x128xi1> to vector<8x128xi1>
    %48 = arith.select %47, %44, %45 : vector<8x128xi1>, vector<8x128xf32>
    %49 = arith.addf %43, %48 : vector<8x128xf32>
    %c126_i32_11 = arith.constant 126 : i32
    %50 = tpu.dynamic_rotate %49 by %c126_i32_11 dim 1 : vector<8x128xf32>, i32 -> vector<8x128xf32>
    %c2_i32_12 = arith.constant 2 : i32
    %51 = tpu.dynamic_rotate %49 by %c2_i32_12 dim 1 : vector<8x128xf32>, i32 -> vector<8x128xf32>
    %52 = vector.shape_cast %9 : vector<1x128xi1> to vector<1x128xi1>
    %53 = vector.broadcast %52 : vector<1x128xi1> to vector<8x128xi1>
    %54 = arith.select %53, %50, %51 : vector<8x128xi1>, vector<8x128xf32>
    %55 = arith.addf %49, %54 : vector<8x128xf32>
    %c124_i32_13 = arith.constant 124 : i32
    %56 = tpu.dynamic_rotate %55 by %c124_i32_13 dim 1 : vector<8x128xf32>, i32 -> vector<8x128xf32>
    %c4_i32_14 = arith.constant 4 : i32
    %57 = tpu.dynamic_rotate %55 by %c4_i32_14 dim 1 : vector<8x128xf32>, i32 -> vector<8x128xf32>
    %58 = vector.shape_cast %13 : vector<1x128xi1> to vector<1x128xi1>
    %59 = vector.broadcast %58 : vector<1x128xi1> to vector<8x128xi1>
    %60 = arith.select %59, %56, %57 : vector<8x128xi1>, vector<8x128xf32>
    %61 = arith.addf %55, %60 : vector<8x128xf32>
    %c120_i32_15 = arith.constant 120 : i32
    %62 = tpu.dynamic_rotate %61 by %c120_i32_15 dim 1 : vector<8x128xf32>, i32 -> vector<8x128xf32>
    %c8_i32_16 = arith.constant 8 : i32
    %63 = tpu.dynamic_rotate %61 by %c8_i32_16 dim 1 : vector<8x128xf32>, i32 -> vector<8x128xf32>
    %64 = vector.shape_cast %17 : vector<1x128xi1> to vector<1x128xi1>
    %65 = vector.broadcast %64 : vector<1x128xi1> to vector<8x128xi1>
    %66 = arith.select %65, %62, %63 : vector<8x128xi1>, vector<8x128xf32>
    %67 = arith.addf %61, %66 : vector<8x128xf32>
    %cst = arith.constant 1.000000e+00 : f32
    %68 = vector.broadcast %cst : f32 to vector<8x128xf32>
    %69 = arith.divf %68, %67 : vector<8x128xf32>
    %70 = arith.mulf %43, %69 : vector<8x128xf32>
    %c0_17 = arith.constant 0 : index
    %c0_18 = arith.constant 0 : index
    %71 = vector.load %arg2[%c0_17, %c0_18] : memref<8x128xf32, #tpu.memory_space<vmem>>, vector<8x128xf32>
    tpu.vector_store %arg2[%c0_17, %c0_18], %70 {strides = array<i32>} : memref<8x128xf32, #tpu.memory_space<vmem>>, vector<8x128xf32>,
    return
  }
  func.func @transform_0(%arg0: i32) -> (i32, i32) {
    %c0_i32 = arith.constant 0 : i32
    %c0_i32_0 = arith.constant 0 : i32
    return %arg0, %c0_i32 : i32, i32
  }
  func.func @transform_1(%arg0: i32) -> (i32, i32) {
    %c0_i32 = arith.constant 0 : i32
    %c0_i32_0 = arith.constant 0 : i32
    return %arg0, %c0_i32 : i32, i32
  }
}

</mosaic_0001>

<bundles_post_ra>
// kernel: tpu_custom_call.1
= control target key start
LH: loop header
LB: loop body
LE: loop exit
PB: predicated region body
PF: predicated region fallthrough
CT: control target
= control target key end

     0   :  { %6 = vsyncpa [#allocation3], 0  ;;  %s703_s0 = inlined_call_operand.hbm [shape: f32[16,128], index: 0, kind: input, shape index: {}]   ;;  %s704_s1 = inlined_call_operand.hbm [shape: f32[16,128], index: 1, kind: output, shape index: {}]  }
   0x1   :  { %8 = vsyncpa [#allocation3 + $0x1], 0 }
   0x2   :  { %9 = vsyncpa [#allocation4], 0 }
   0x3   :  { %11 = vsyncpa [#allocation4 + $0x1], 0  ;;  %s500_s6 = smov 0   ;;  %s502_s7 = smov 0  }
   0x4   :  { %s504_s8 = smov 0   ;;  %s506_s9 = smov 0  }
   0x5 LB: > { %s521_s10 = sadd.s32 4294967295, %s477_s9   ;;  %s314_s11 = sadd.s32 4294967294, %s477_s9   ;;  %s477_s9 = sphi %s506_s9, %s729_s9   ;;  %s473_s8 = sphi %s504_s8, %s728_s8   ;;  %s469_s7 = sphi %s502_s7, %s727_s7   ;;  %s465_s6 = sphi %s500_s6, %s726_s6  }
   0x6   : > { %s525_s12 = sadd.s32 1, %s477_s9   ;;  %s24_s13 = sadd.s32 1, %s473_s8 }
   0x7   : > { %s21_s14 = ssub.s32 %s477_s9, %s525_s12  ;;  %p31_p0 = scmp.ne.s32.totalorder %s473_s8, %s469_s7 }
   0x8   : > { %p22_p1 = scmp.eq.s32.totalorder %s21_s14, 0  ;;  %p32_p2 = scmp.eq.s32.totalorder %s477_s9, 0 }
   0x9   : > { %p37_p3 = scmp.ne.s32.totalorder %s469_s7, %s465_s6  ;;  %p38_p4 = scmp.eq.s32.totalorder %s521_s10, 0 }
   0xa   : > { %s537_s15 = scalar_select %p22_p1, %s473_s8, %s24_s13  }
   0xb   : > { %p539_p5 = por %p32_p2, %p31_p0  ;;  %p543_p6 = por %p38_p4, %p37_p3 }
   0xc   : > { %p61_p7 = scmp.eq.s32.totalorder %s521_s10, 1  ;;  %p67_p8 = scmp.eq.s32.totalorder %s314_s11, 1 }
   0xd   : > { %s708_s17 = scalar_select %p543_p6, 1, 0 }
   0xe   : > { %p338_p10 = scmp.lt.s32.totalorder %s477_s9, 2  ;;  %p550_p11 = por %p61_p7, %p31_p0 }
   0xf   : > { %p554_p12 = por %p67_p8, %p37_p3  ;;  %s87_s20 = sand.u32 1, %s473_s8  }
  0x10   : > { %s709_s18 = scalar_select %p550_p11, 1, 0 }
  0x11   : > { %s710_s19 = scalar_select %p554_p12, 1, 0 }
  0x12   : > { %s318_s21 = sshll.u32 %s477_s9, 7  ;;  %s317_s22 = sshll.u32 %s87_s20, 3 }
  0x13   : > { %s563_s25 = scalar_lea.hbm %s703_s0, %s318_s21  ;;  %s91_s26 = scalar_lea.vmem [#allocation2], %s317_s22 }
  0x14   : > { %s98_s27 = sshll.u32 %s91_s26, 4  ;;  %p567_p13 = pnand %p338_p10, %p539_p5  ;;  %s571_s27 = int_to_ptr.vmem [resolvable:$true] %s98_s27 }
  0x15   : > { %s88_s29 = scalar_lea.sflag [#allocation3], %s87_s20  ;;  %s385_s30 = scalar_lea.hbm %s563_s25, 128 }
  0x16   : > { %p386_p2 = scmp.ne.s32.totalorder %s563_s25, %s385_s30  ;;  %p387_p3 = pneg %p567_p13 }
  0x17   : > { %s390_s4 = scalar_lea.hbm %s703_s0, 256  ;;  %p391_p5 = scmp.lt.s32.totalorder %s563_s25, %s703_s0 }
  0x18   : > { %p388_p4 = pnand %p387_p3, %p386_p2  ;;  %p392_p8 = scmp.lt.s32.totalorder %s390_s4, %s385_s30 }
  0x1a   : > { %p389_p7 = pneg %p388_p4  ;;  %p393_p10 = por %p392_p8, %p391_p5 }
  0x1c   : > { %p394_p9 = pnand %p393_p10, %p389_p7 }
  0x1e   : > { %397 = shalt.err (!%p394_p9)
}
  0x1f   : > { %s398_s13 = scalar_lea.vmem %s571_s27, 128  ;;  %s479_s14 = smov [#allocation2]  }
  0x20   : > { %p399_p0 = scmp.ne.s32.totalorder %s571_s27, %s398_s13  ;;  %s403_s16 = sshll.u32 %s479_s14, 4  ;;  %s404_s16 = int_to_ptr.vmem [resolvable:$false] %s403_s16 }
  0x21   : > { %s405_s20 = scalar_lea.vmem %s404_s16, 256  ;;  %p406_p4 = scmp.lt.s32.totalorder %s571_s27, %s404_s16 }
  0x22   : > { %p401_p1 = pnand %p399_p0, %p387_p3  ;;  %p407_p12 = scmp.lt.s32.totalorder %s405_s20, %s398_s13 }
  0x24   : > { %p402_p2 = pneg %p401_p1  ;;  %p408_p11 = por %p407_p12, %p406_p4 }
  0x26   : > { %p409_p6 = pnand %p408_p11, %p402_p2 }
  0x28   : > { %412 = shalt.err (!%p409_p6)
}
  0x29   : > { %333 = dma.hbm_to_vmem [thread:$0]  (!%p567_p13), %s563_s25, 128, %s571_s27, %s88_s29  }
  0x2a   : > { %p712_p9 = scmp.lt.s32.totalorder %s477_s9, 3  ;;  %p713_p7 = scmp.ge.s32.totalorder %s477_s9, 1 }
  0x2c   : > { %p104_p0 = pnand %p713_p7, %p712_p9 }
  0x2d   : > { %s598_s21 = sand.u32 (!%p104_p0), 1, %s469_s7   ;;  %p714_p6 = scmp.ne.s32.totalorder (!%p104_p0), %s708_s17, 0 }
  0x2e   : > { %107 = sbr.rel (%p104_p0) target bundleno = 1052 (0x41c), region = 24  ;;  %s320_s22 = sshll.u32 (!%p104_p0), %s598_s21, 3 }
  0x2f   : > { %s110_s23 = scalar_lea.sflag (!%p104_p0), [#allocation3], %s598_s21  ;;  %s113_s24 = scalar_lea.vmem (!%p104_p0), [#allocation2], %s320_s22 }
  0x33   : > { %456 = dma.done.wait (%p714_p6), %s110_s23, 128  }
  0x34   : > { %458 = vsyncadd (%p714_p6), %s110_s23, 4294967168  ;;  %v133_v0 = vlaneseq  ;;  %s480_s25 = smov 127   ;;  %v609_v2 = vld [vmem:[%s113_s24] sm:$0xff]  ;;  %s481_s26 = smov 1   ;;  %v483_v7 = vmov 0  }
  0x35   : > { %153 = vrot.lane.b32.xlu1 %v609_v2, %s481_s26  ;;  %s482_s27 = smov 126   ;;  %s484_s17 = smov 2  }
  0x36   : > { %v134_v1 = vand.u32 127, %v133_v0  ;;  %v157_v3 = vshrl.u32 %v133_v0, 7  ;;  %s485_s28 = smov 124   ;;  %s486_s29 = smov 4  }
  0x37   : > { %s487_s30 = smov 120   ;;  %s488_s2 = smov 8  }
  0x38   : > { %135 = vrot.lane.b32.xlu0 %v134_v1, %s480_s25  ;;  %v137_v4 = vxor.u32 1, %v134_v1  ;;  %v158_v5 = vsub.s32 0, %v157_v3  ;;  %v141_v15 = vxor.u32 2, %v134_v1  ;;  %v145_v24 = vxor.u32 4, %v134_v1  ;;  %s323_s3 = sshll.u32 %s521_s10, 7  ;;  %s131_s4 = scalar_lea.vmem [#allocation5], %s320_s22 }
  0x39   : > { %139 = vrot.lane.b32.xlu1 %v134_v1, %s482_s27  ;;  %v149_v33 = vxor.u32 8, %v134_v1  ;;  %s244_s5 = sshll.u32 %s131_s4, 4  ;;  %s242_s14 = scalar_lea.hbm %s704_s1, %s323_s3  ;;  %s245_s5 = int_to_ptr.vmem [resolvable:$true] %s244_s5 }
  0x3a   : > { %s231_s16 = scalar_lea.sflag [#allocation4], %s598_s21  ;;  %s413_s20 = scalar_lea.vmem %s245_s5, 128 }
  0x3b   : > { %p414_p11 = scmp.ne.s32.totalorder %s245_s5, %s413_s20  ;;  %p723_p12 = scmp.ne.s32.totalorder %s709_s18, 0 }
  0x3c   : > { %151 = vrot.lane.b32.xlu0 %v609_v2, %s480_s25  ;;  %s489_s23 = smov [#allocation5]  }
  0x3d   : > { %p415_p13 = pnand %p414_p11, %p723_p12  ;;  %s417_s24 = sshll.u32 %s489_s23, 4  ;;  %s418_s24 = int_to_ptr.vmem [resolvable:$false] %s417_s24 }
  0x3e   : > { %s419_s10 = scalar_lea.vmem %s418_s24, 256  ;;  %p420_p3 = scmp.lt.s32.totalorder %s245_s5, %s418_s24 }
  0x3f   : > { %p416_p1 = pneg %p415_p13  ;;  %p421_p5 = scmp.lt.s32.totalorder %s419_s10, %s413_s20 }
  0x41   : > { %p422_p8 = por %p421_p5, %p420_p3 }
  0x43   : > { %p423_p10 = pnand %p422_p8, %p416_p1 }
  0xa7   : > { %v154_v10 = vpop.permute.xlu1 %153 }
  0xaa   : > { %v136_v6 = vpop.permute.xlu0 %135 }
  0xab   : > { %vm138_vm0 = vcmp.eq.s32.totalorder %v136_v6, %v137_v4  ;;  %v140_v16 = vpop.permute.xlu1 %139 }
  0xac   : > { %v155_v8 = vsel %vm138_vm0, 1, %v483_v7  ;;  %vm142_vm2 = vcmp.eq.s32.totalorder %v140_v16, %v141_v15 }
  0xad   : > { %v159_v9 = vrot.slane %v155_v8, %v158_v5  ;;  %v167_v17 = vsel %vm142_vm2, 1, %v483_v7 }
  0xae   : > { %v152_v11 = vpop.permute.xlu0 %151  ;;  %v171_v18 = vrot.slane %v167_v17, %v158_v5 }
  0xaf   : > { %vm616_vm1 = vcmp.eq.s32.totalorder %v159_v9, 1 }
  0xb0   : > { %v161_v13 = vsel %vm616_vm1, %v152_v11, %v154_v10  ;;  %vm626_vm3 = vcmp.eq.s32.totalorder %v171_v18, 1 }
  0xb1   : > { %v162_v14 = vmax.f32 %v609_v2, %v161_v13 }
  0xb3   : > { %165 = vrot.lane.b32.xlu1 %v162_v14, %s484_s17  ;;  %163 = vrot.lane.b32.xlu0 %v162_v14, %s482_s27 }
  0xb7   : > { %143 = vrot.lane.b32.xlu0 %v134_v1, %s485_s28 }
 0x125   : > { %v166_v20 = vpop.permute.xlu1 %165  ;;  %v164_v21 = vpop.permute.xlu0 %163 }
 0x126   : > { %v173_v22 = vsel %vm626_vm3, %v164_v21, %v166_v20 }
 0x127   : > { %v174_v23 = vmax.f32 %v162_v14, %v173_v22 }
 0x129   : > { %177 = vrot.lane.b32.xlu0 %v174_v23, %s486_s29  ;;  %175 = vrot.lane.b32.xlu1 %v174_v23, %s485_s28  ;;  %v144_v25 = vpop.permute.xlu0 %143 }
 0x12a   : > { %vm146_vm4 = vcmp.eq.s32.totalorder %v144_v25, %v145_v24 }
 0x12b   : > { %v179_v26 = vsel %vm146_vm4, 1, %v483_v7 }
 0x12c   : > { %v183_v27 = vrot.slane %v179_v26, %v158_v5 }
 0x12d   : > { %147 = vrot.lane.b32.xlu1 %v134_v1, %s487_s30 }
 0x12e   : > { %vm635_vm5 = vcmp.eq.s32.totalorder %v183_v27, 1 }
 0x19b   : > { %v176_v29 = vpop.permute.xlu1 %175  ;;  %v178_v30 = vpop.permute.xlu0 %177 }
 0x19c   : > { %v185_v31 = vsel %vm635_vm5, %v176_v29, %v178_v30 }
 0x19d   : > { %v186_v32 = vmax.f32 %v174_v23, %v185_v31 }
 0x19f   : > { %189 = vrot.lane.b32.xlu1 %v186_v32, %s488_s2  ;;  %187 = vrot.lane.b32.xlu0 %v186_v32, %s487_s30  ;;  %v148_v34 = vpop.permute.xlu1 %147 }
 0x1a0   : > { %vm150_vm6 = vcmp.eq.s32.totalorder %v148_v34, %v149_v33 }
 0x1a1   : > { %v191_v35 = vsel %vm150_vm6, 1, %v483_v7 }
 0x1a2   : > { %v195_v36 = vrot.slane %v191_v35, %v158_v5 }
 0x1a4   : > { %vm643_vm7 = vcmp.eq.s32.totalorder %v195_v36, 1 }
 0x211   : > { %v190_v38 = vpop.permute.xlu1 %189  ;;  %v188_v39 = vpop.permute.xlu0 %187 }
 0x212   : > { %v197_v40 = vsel %vm643_vm7, %v188_v39, %v190_v38 }
 0x213   : > { %v198_v41 = vmax.f32 %v186_v32, %v197_v40 }
 0x215   : > { %v199_v42 = vsub.f32 %v609_v2, %v198_v41 }
 0x217   : > { %v200_v43 = vmul.f32 1.442695, %v199_v42 }
 0x219   : > { %381 = vpow2.f32 %v200_v43 }
 0x226   : > { %v382_v44 = vpop.eup %381 }
 0x227   : > { %204 = vrot.lane.b32.xlu1 %v382_v44, %s481_s26  ;;  %202 = vrot.lane.b32.xlu0 %v382_v44, %s480_s25 }
 0x299   : > { %v205_v45 = vpop.permute.xlu1 %204  ;;  %v203_v46 = vpop.permute.xlu0 %202 }
 0x29a   : > { %v206_v47 = vsel %vm616_vm1, %v203_v46, %v205_v45 }
 0x29b   : > { %v207_v48 = vadd.f32 %v382_v44, %v206_v47 }
 0x29d   : > { %210 = vrot.lane.b32.xlu1 %v207_v48, %s484_s17  ;;  %208 = vrot.lane.b32.xlu0 %v207_v48, %s482_s27 }
 0x30f   : > { %v211_v49 = vpop.permute.xlu1 %210  ;;  %v209_v50 = vpop.permute.xlu0 %208 }
 0x310   : > { %v212_v51 = vsel %vm626_vm3, %v209_v50, %v211_v49 }
 0x311   : > { %v213_v52 = vadd.f32 %v212_v51, %v207_v48 }
 0x313   : > { %216 = vrot.lane.b32.xlu1 %v213_v52, %s486_s29  ;;  %214 = vrot.lane.b32.xlu0 %v213_v52, %s485_s28 }
 0x385   : > { %v217_v53 = vpop.permute.xlu1 %216  ;;  %v215_v54 = vpop.permute.xlu0 %214 }
 0x386   : > { %v218_v55 = vsel %vm635_vm5, %v215_v54, %v217_v53 }
 0x387   : > { %v219_v56 = vadd.f32 %v218_v55, %v213_v52 }
 0x389   : > { %222 = vrot.lane.b32.xlu1 %v219_v56, %s488_s2  ;;  %220 = vrot.lane.b32.xlu0 %v219_v56, %s487_s30 }
 0x3fb   : > { %v223_v57 = vpop.permute.xlu1 %222  ;;  %v221_v58 = vpop.permute.xlu0 %220 }
 0x3fc   : > { %v224_v59 = vsel %vm643_vm7, %v221_v58, %v223_v57 }
 0x3fd   : > { %v225_v60 = vadd.f32 %v224_v59, %v219_v56 }
 0x3ff   : > { %383 = vrcp.f32 %v225_v60 }
 0x40c   : > { %v384_v61 = vpop.eup %383 }
 0x40d   : > { %v228_v62 = vmul.f32 %v384_v61, %v382_v44 }
 0x40f   : > { %229 = vst [vmem:[%s131_s4] sm:$0xff] %v228_v62 }
 0x410   : > { %426 = shalt.err (!%p423_p10)
}
 0x411   : > { %s427_s22 = scalar_lea.hbm %s242_s14, 128  ;;  %s431_s26 = scalar_lea.hbm %s704_s1, 256 }
 0x412   : > { %p428_p2 = scmp.ne.s32.totalorder %s242_s14, %s427_s22  ;;  %p432_p7 = scmp.lt.s32.totalorder %s242_s14, %s704_s1 }
 0x413   : > { %p433_p0 = scmp.lt.s32.totalorder %s431_s26, %s427_s22 }
 0x414   : > { %p429_p4 = pnand %p428_p2, %p723_p12 }
 0x415   : > { %p434_p6 = por %p433_p0, %p432_p7 }
 0x416   : > { %p430_p9 = pneg %p429_p4 }
 0x418   : > { %p435_p11 = pnand %p434_p6, %p430_p9 }
 0x41a   : > { %438 = shalt.err (!%p435_p11)
}
 0x41b   : > { %328 = dma.vmem_to_hbm [thread:$0]  (%p723_p12), %s245_s5, 128, %s242_s14, %s231_s16  }
 0x41c PF: > { %s256_s28 = sand.u32 1, %s465_s6   ;;  %p724_p13 = scmp.ne.s32.totalorder %s710_s19, 0 }
 0x41d   : > { %p725_p1 = scmp.ge.s32.totalorder %s477_s9, 2  ;;  %s257_s29 = scalar_lea.sflag [#allocation4], %s256_s28 }
 0x41f   : > { %p335_p3 = pnand %p725_p1, %p724_p13 }
 0x421   : > { %p336_p5 = pneg %p335_p3 }
 0x423   : > { %460 = dma.done.wait (%p336_p5), %s257_s29, 128  }
 0x424   : > { %462 = vsyncadd (%p336_p5), %s257_s29, 4294967168  ;;  %p14_p8 = scmp.ge.s32.totalorder %s525_s12, 4   ;;  %s726_s6 = smov %s469_s7 }
 0x425   : > { %s727_s7 = smov %s473_s8  ;;  %s728_s8 = smov %s537_s15 }
 0x426   : > { %s729_s9 = smov %s525_s12  ;;  %16 = sbr.rel (!%p14_p8) target bundleno = 5 (0x5), region = 69 }
 0x42b   :  { %262 = vsyncpa [#allocation3], 1 }
 0x42c   :  { %264 = vsyncpa [#allocation3 + $0x1], 1 }
 0x42d   :  { %265 = vsyncpa [#allocation4], 1 }
 0x42e   :  { %267 = vsyncpa [#allocation4 + $0x1], 1 }

</bundles_post_ra>
